<compile_context>
chip_gen: v7x
topology: tpu7x:2x2x1
jax: 0.10.0
libtpu: 0.0.40
codegen_flags: <defaults>
</compile_context>

<pallas_src>
import functools

import numpy as np
import jax
import jax.numpy as jnp
from jax.experimental import pallas as pl
from jax.experimental.pallas import tpu as pltpu


# On v6e/v7x with large channel counts, set to jnp.bfloat16 for ~3x MXU
# throughput (accumulation stays f32 via preferred_element_type).  Kept f32
# here: with C2 <= 8 the dots are negligible (kernel is DMA/VPU bound) and the
# test compares against a HIGHEST-precision f32 reference.
_MXU_DTYPE = jnp.float32


def _border_masks(H, W):
    """(9, H*W) 0/1 masks: tap (dy,dx) is valid where the shifted pixel exists."""
    ys, xs = np.meshgrid(np.arange(H), np.arange(W), indexing="ij")
    rows = []
    for dy in (-1, 0, 1):
        for dx in (-1, 0, 1):
            ok = ((ys + dy >= 0) & (ys + dy < H) &
                  (xs + dx >= 0) & (xs + dx < W))
            rows.append(ok.reshape(-1))
    return jnp.asarray(np.stack(rows), dtype=jnp.float32)


def _residual_unit_kernel(x_ref, w1_ref, b1_ref, w2_ref, b2_ref, w3_ref, b3_ref,
                          m_ref, o_ref, *, img_w):
    # x_ref: (N, L) with L = H*W in the lane dim (lane-dense).
    _, L = x_ref.shape
    x = x_ref[...].astype(jnp.float32)

    # ---- conv1 (1x1) + ReLU: channel mix from the left keeps pixels in lanes.
    h1 = jnp.maximum(
        jnp.dot(w1_ref[...].astype(_MXU_DTYPE), x.astype(_MXU_DTYPE),
                preferred_element_type=jnp.float32) + b1_ref[...],
        0.0)                                                     # (C2, L)

    # ---- conv2 (3x3, SAME) as a single im2col matmul.
    # Each tap is a lane roll of h1 (XLU) with image-border taps zeroed by a
    # precomputed mask (one VPU mul).  Rolls that cross a row / image boundary
    # land only on masked-out positions, so wraparound is harmless.
    taps = [(dy, dx) for dy in (-1, 0, 1) for dx in (-1, 0, 1)]
    windows = []
    for t, (dy, dx) in enumerate(taps):
        off = dy * img_w + dx                  # flattened-pixel offset of tap
        win = h1 if off == 0 else pltpu.roll(h1, shift=(-off) % L, axis=1)
        windows.append(win * m_ref[t:t + 1, :])
    stacked = jnp.concatenate(windows, axis=0)                   # (9*C2, L)
    h2 = jnp.maximum(
        jnp.dot(w2_ref[...].astype(_MXU_DTYPE), stacked.astype(_MXU_DTYPE),
                preferred_element_type=jnp.float32) + b2_ref[...],
        0.0)                                                     # (C2, L)

    # ---- conv3 (1x1) + residual + final ReLU; lane-dense (N, L) store.
    h3 = (jnp.dot(w3_ref[...].astype(_MXU_DTYPE), h2.astype(_MXU_DTYPE),
                  preferred_element_type=jnp.float32) + b3_ref[...])
    o_ref[...] = jnp.maximum(h3 + x, 0.0).astype(o_ref.dtype)


def residual_unit_pallas(x_nchw, params):
    """ResidualUnit forward. x_nchw: (B, N, H, W) float32 -> (B, N, H, W)."""
    w1, b1, w2, b2, w3, b3 = params
    B, N, H, W = x_nchw.shape
    C2 = w1.shape[1]
    L = H * W

    # NCHW is contiguous as (B, N, H*W): free reshape, no transpose needed.
    x = x_nchw.reshape(B, N, L)

    # Kernel-layout weights (tiny, one-time): mixing matrices act from the
    # left so matmul results keep pixels in the lane dimension.
    w1t = jnp.transpose(w1)                                              # (C2, N)
    w2m = jnp.transpose(w2.reshape(9, C2, C2), (2, 0, 1)).reshape(C2, 9 * C2)
    w3t = jnp.transpose(w3)                                              # (N, C2)
    b1c = b1.reshape(C2, 1)
    b2c = b2.reshape(C2, 1)
    b3c = b3.reshape(N, 1)
    mask9 = _border_masks(H, W)                                          # (9, L)

    kernel = functools.partial(_residual_unit_kernel, img_w=W)
    batch_map = lambda b: (b, 0, 0)
    const2 = lambda b: (0, 0)

    out = pl.pallas_call(
        kernel,
        out_shape=jax.ShapeDtypeStruct((B, N, L), x.dtype),
        grid_spec=pltpu.PrefetchScalarGridSpec(
            num_scalar_prefetch=0,
            grid=(B,),                                  # independent images
            in_specs=[
                pl.BlockSpec((pl.Squeezed(), N, L), batch_map),   # activations
                pl.BlockSpec((C2, N), const2),                    # w1^T
                pl.BlockSpec((C2, 1), const2),                    # b1
                pl.BlockSpec((C2, 9 * C2), const2),               # w2 (im2col)
                pl.BlockSpec((C2, 1), const2),                    # b2
                pl.BlockSpec((N, C2), const2),                    # w3^T
                pl.BlockSpec((N, 1), const2),                     # b3
                pl.BlockSpec((9, L), const2),                     # border masks
            ],
            out_specs=pl.BlockSpec((pl.Squeezed(), N, L), batch_map),
        ),
        compiler_params=pltpu.CompilerParams(
            dimension_semantics=("parallel",)),   # megacore-shard batch on v7x
    )(x, w1t, b1c, w2m, b2c, w3t, b3c, mask9)
    return out.reshape(B, N, H, W)


def residual_unit_reference(x_nchw, params):
    """Pure-JAX reference using lax.conv (NHWC / HWIO)."""
    w1, b1, w2, b2, w3, b3 = params
    x = jnp.transpose(x_nchw, (0, 2, 3, 1))
    dn = ('NHWC', 'HWIO', 'NHWC')
    hi = jax.lax.Precision.HIGHEST

    h1 = jax.nn.relu(
        jax.lax.conv_general_dilated(x, w1.reshape(1, 1, *w1.shape), (1, 1),
                                     'SAME', dimension_numbers=dn, precision=hi)
        + b1.reshape(1, 1, 1, -1))
    h2 = jax.nn.relu(
        jax.lax.conv_general_dilated(h1, w2, (1, 1), 'SAME',
                                     dimension_numbers=dn, precision=hi)
        + b2.reshape(1, 1, 1, -1))
    h3 = (jax.lax.conv_general_dilated(h2, w3.reshape(1, 1, *w3.shape), (1, 1),
                                       'SAME', dimension_numbers=dn,
                                       precision=hi)
          + b3.reshape(1, 1, 1, -1))
    out = jax.nn.relu(h3 + x)
    return jnp.transpose(out, (0, 3, 1, 2))


def make_params(key, N):
    C2 = N // 2
    ks = jax.random.split(key, 6)
    w1 = jax.random.normal(ks[0], (N, C2), jnp.float32) * 0.2        # 1x1: in->out
    b1 = jax.random.normal(ks[1], (1, C2), jnp.float32) * 0.1
    w2 = jax.random.normal(ks[2], (3, 3, C2, C2), jnp.float32) * 0.2  # HWIO
    b2 = jax.random.normal(ks[3], (1, C2), jnp.float32) * 0.1
    w3 = jax.random.normal(ks[4], (C2, N), jnp.float32) * 0.2        # 1x1: in->out
    b3 = jax.random.normal(ks[5], (1, N), jnp.float32) * 0.1
    return (w1, b1, w2, b2, w3, b3)


if __name__ == "__main__":
    key = jax.random.PRNGKey(0)
    k_x, k_p = jax.random.split(key)

    B, N, H, W = 2, 8, 16, 16          # N must be even (N//2 hidden channels)
    x = jax.random.normal(k_x, (B, N, H, W), jnp.float32)
    params = make_params(k_p, N)

    out = jax.block_until_ready(residual_unit_pallas(x, params))
    ref = residual_unit_reference(x, params)

    assert out.shape == ref.shape == (B, N, H, W)
    assert jnp.allclose(out, ref, atol=1e-4, rtol=1e-4), \
        f"max abs diff {jnp.max(jnp.abs(out - ref))}"

    print("KERNEL_OK")
</pallas_src>

<mosaic_0001>
module attributes {stable_mosaic.version = 11 : i64} {
  func.func @_residual_unit_kernel(%arg0: i32, %arg1: memref<1x8x256xf32, #tpu.memory_space<vmem>>, %arg2: memref<4x8xf32, #tpu.memory_space<vmem>>, %arg3: memref<4x1xf32, #tpu.memory_space<vmem>>, %arg4: memref<4x36xf32, #tpu.memory_space<vmem>>, %arg5: memref<4x1xf32, #tpu.memory_space<vmem>>, %arg6: memref<8x4xf32, #tpu.memory_space<vmem>>, %arg7: memref<8x1xf32, #tpu.memory_space<vmem>>, %arg8: memref<9x256xf32, #tpu.memory_space<vmem>>, %arg9: memref<1x8x256xf32, #tpu.memory_space<vmem>>) attributes {dimension_semantics = [#tpu.dimension_semantics<parallel>], iteration_bounds = array<i64: 2>, scalar_prefetch = 0 : i64, scratch_operands = 0 : i64, tpu.core_type = #tpu.core_type<tc>, window_params = [{transform_indices = @transform_0, window_bounds = array<i64: 1, 8, 256>}, {pipeline_mode = #tpu.pipeline_mode<synchronous>, transform_indices = @transform_1, window_bounds = array<i64: 4, 8>}, {pipeline_mode = #tpu.pipeline_mode<synchronous>, transform_indices = @transform_2, window_bounds = array<i64: 4, 1>}, {pipeline_mode = #tpu.pipeline_mode<synchronous>, transform_indices = @transform_3, window_bounds = array<i64: 4, 36>}, {pipeline_mode = #tpu.pipeline_mode<synchronous>, transform_indices = @transform_4, window_bounds = array<i64: 4, 1>}, {pipeline_mode = #tpu.pipeline_mode<synchronous>, transform_indices = @transform_5, window_bounds = array<i64: 8, 4>}, {pipeline_mode = #tpu.pipeline_mode<synchronous>, transform_indices = @transform_6, window_bounds = array<i64: 8, 1>}, {pipeline_mode = #tpu.pipeline_mode<synchronous>, transform_indices = @transform_7, window_bounds = array<i64: 9, 256>}, {transform_indices = @transform_8, window_bounds = array<i64: 1, 8, 256>}]} {
    %c0 = arith.constant 0 : index
    %c0_0 = arith.constant 0 : index
    %c0_1 = arith.constant 0 : index
    %0 = vector.load %arg1[%c0, %c0_0, %c0_1] : memref<1x8x256xf32, #tpu.memory_space<vmem>>, vector<1x8x256xf32>
    %1 = vector.shape_cast %0 : vector<1x8x256xf32> to vector<8x256xf32>
    %c0_2 = arith.constant 0 : index
    %c0_3 = arith.constant 0 : index
    %2 = vector.load %arg2[%c0_2, %c0_3] : memref<4x8xf32, #tpu.memory_space<vmem>>, vector<4x8xf32>
    %cst = arith.constant dense<0.000000e+00> : vector<4x256xf32>
    %3 = tpu.matmul %2, %1, %cst {dimension_numbers = #tpu.dot_dimension_numbers<[1], [0], [0], [1], [0, 0, 1, 1], [], []>} : vector<4x8xf32>, vector<8x256xf32>, vector<4x256xf32> -> vector<4x256xf32>
    %c0_4 = arith.constant 0 : index
    %c0_5 = arith.constant 0 : index
    %4 = vector.load %arg3[%c0_4, %c0_5] : memref<4x1xf32, #tpu.memory_space<vmem>>, vector<4x1xf32>
    %5 = vector.broadcast %4 : vector<4x1xf32> to vector<4x256xf32>
    %6 = arith.addf %3, %5 : vector<4x256xf32>
    %cst_6 = arith.constant 0.000000e+00 : f32
    %7 = vector.broadcast %cst_6 : f32 to vector<4x256xf32>
    %8 = arith.maximumf %6, %7 : vector<4x256xf32>
    %c17_i32 = arith.constant 17 : i32
    %9 = tpu.dynamic_rotate %8 by %c17_i32 dim 1 : vector<4x256xf32>, i32 -> vector<4x256xf32>
    %c0_7 = arith.constant 0 : index
    %c0_8 = arith.constant 0 : index
    %10 = vector.load %arg8[%c0_7, %c0_8] : memref<9x256xf32, #tpu.memory_space<vmem>>, vector<1x256xf32>
    %11 = vector.broadcast %10 : vector<1x256xf32> to vector<4x256xf32>
    %12 = arith.mulf %9, %11 : vector<4x256xf32>
    %c16_i32 = arith.constant 16 : i32
    %13 = tpu.dynamic_rotate %8 by %c16_i32 dim 1 : vector<4x256xf32>, i32 -> vector<4x256xf32>
    %c1 = arith.constant 1 : index
    %c0_9 = arith.constant 0 : index
    %14 = vector.load %arg8[%c1, %c0_9] : memref<9x256xf32, #tpu.memory_space<vmem>>, vector<1x256xf32>
    %15 = vector.broadcast %14 : vector<1x256xf32> to vector<4x256xf32>
    %16 = arith.mulf %13, %15 : vector<4x256xf32>
    %c15_i32 = arith.constant 15 : i32
    %17 = tpu.dynamic_rotate %8 by %c15_i32 dim 1 : vector<4x256xf32>, i32 -> vector<4x256xf32>
    %c2 = arith.constant 2 : index
    %c0_10 = arith.constant 0 : index
    %18 = vector.load %arg8[%c2, %c0_10] : memref<9x256xf32, #tpu.memory_space<vmem>>, vector<1x256xf32>
    %19 = vector.broadcast %18 : vector<1x256xf32> to vector<4x256xf32>
    %20 = arith.mulf %17, %19 : vector<4x256xf32>
    %c1_i32 = arith.constant 1 : i32
    %21 = tpu.dynamic_rotate %8 by %c1_i32 dim 1 : vector<4x256xf32>, i32 -> vector<4x256xf32>
    %c3 = arith.constant 3 : index
    %c0_11 = arith.constant 0 : index
    %22 = vector.load %arg8[%c3, %c0_11] : memref<9x256xf32, #tpu.memory_space<vmem>>, vector<1x256xf32>
    %23 = vector.broadcast %22 : vector<1x256xf32> to vector<4x256xf32>
    %24 = arith.mulf %21, %23 : vector<4x256xf32>
    %c4 = arith.constant 4 : index
    %c0_12 = arith.constant 0 : index
    %25 = vector.load %arg8[%c4, %c0_12] : memref<9x256xf32, #tpu.memory_space<vmem>>, vector<1x256xf32>
    %26 = vector.broadcast %25 : vector<1x256xf32> to vector<4x256xf32>
    %27 = arith.mulf %8, %26 : vector<4x256xf32>
    %c255_i32 = arith.constant 255 : i32
    %28 = tpu.dynamic_rotate %8 by %c255_i32 dim 1 : vector<4x256xf32>, i32 -> vector<4x256xf32>
    %c5 = arith.constant 5 : index
    %c0_13 = arith.constant 0 : index
    %29 = vector.load %arg8[%c5, %c0_13] : memref<9x256xf32, #tpu.memory_space<vmem>>, vector<1x256xf32>
    %30 = vector.broadcast %29 : vector<1x256xf32> to vector<4x256xf32>
    %31 = arith.mulf %28, %30 : vector<4x256xf32>
    %c241_i32 = arith.constant 241 : i32
    %32 = tpu.dynamic_rotate %8 by %c241_i32 dim 1 : vector<4x256xf32>, i32 -> vector<4x256xf32>
    %c6 = arith.constant 6 : index
    %c0_14 = arith.constant 0 : index
    %33 = vector.load %arg8[%c6, %c0_14] : memref<9x256xf32, #tpu.memory_space<vmem>>, vector<1x256xf32>
    %34 = vector.broadcast %33 : vector<1x256xf32> to vector<4x256xf32>
    %35 = arith.mulf %32, %34 : vector<4x256xf32>
    %c240_i32 = arith.constant 240 : i32
    %36 = tpu.dynamic_rotate %8 by %c240_i32 dim 1 : vector<4x256xf32>, i32 -> vector<4x256xf32>
    %c7 = arith.constant 7 : index
    %c0_15 = arith.constant 0 : index
    %37 = vector.load %arg8[%c7, %c0_15] : memref<9x256xf32, #tpu.memory_space<vmem>>, vector<1x256xf32>
    %38 = vector.broadcast %37 : vector<1x256xf32> to vector<4x256xf32>
    %39 = arith.mulf %36, %38 : vector<4x256xf32>
    %c239_i32 = arith.constant 239 : i32
    %40 = tpu.dynamic_rotate %8 by %c239_i32 dim 1 : vector<4x256xf32>, i32 -> vector<4x256xf32>
    %c8 = arith.constant 8 : index
    %c0_16 = arith.constant 0 : index
    %41 = vector.load %arg8[%c8, %c0_16] : memref<9x256xf32, #tpu.memory_space<vmem>>, vector<1x256xf32>
    %42 = vector.broadcast %41 : vector<1x256xf32> to vector<4x256xf32>
    %43 = arith.mulf %40, %42 : vector<4x256xf32>
    %44 = tpu.concatenate %12, %16, %20, %24, %27, %31, %35, %39, %43 in 0 : vector<4x256xf32>, vector<4x256xf32>, vector<4x256xf32>, vector<4x256xf32>, vector<4x256xf32>, vector<4x256xf32>, vector<4x256xf32>, vector<4x256xf32>, vector<4x256xf32> -> vector<36x256xf32>
    %c0_17 = arith.constant 0 : index
    %c0_18 = arith.constant 0 : index
    %45 = vector.load %arg4[%c0_17, %c0_18] : memref<4x36xf32, #tpu.memory_space<vmem>>, vector<4x36xf32>
    %cst_19 = arith.constant dense<0.000000e+00> : vector<4x256xf32>
    %46 = tpu.matmul %45, %44, %cst_19 {dimension_numbers = #tpu.dot_dimension_numbers<[1], [0], [0], [1], [0, 0, 1, 1], [], []>} : vector<4x36xf32>, vector<36x256xf32>, vector<4x256xf32> -> vector<4x256xf32>
    %c0_20 = arith.constant 0 : index
    %c0_21 = arith.constant 0 : index
    %47 = vector.load %arg5[%c0_20, %c0_21] : memref<4x1xf32, #tpu.memory_space<vmem>>, vector<4x1xf32>
    %48 = vector.broadcast %47 : vector<4x1xf32> to vector<4x256xf32>
    %49 = arith.addf %46, %48 : vector<4x256xf32>
    %cst_22 = arith.constant 0.000000e+00 : f32
    %50 = vector.broadcast %cst_22 : f32 to vector<4x256xf32>
    %51 = arith.maximumf %49, %50 : vector<4x256xf32>
    %c0_23 = arith.constant 0 : index
    %c0_24 = arith.constant 0 : index
    %52 = vector.load %arg6[%c0_23, %c0_24] : memref<8x4xf32, #tpu.memory_space<vmem>>, vector<8x4xf32>
    %cst_25 = arith.constant dense<0.000000e+00> : vector<8x256xf32>
    %53 = tpu.matmul %52, %51, %cst_25 {dimension_numbers = #tpu.dot_dimension_numbers<[1], [0], [0], [1], [0, 0, 1, 1], [], []>} : vector<8x4xf32>, vector<4x256xf32>, vector<8x256xf32> -> vector<8x256xf32>
    %c0_26 = arith.constant 0 : index
    %c0_27 = arith.constant 0 : index
    %54 = vector.load %arg7[%c0_26, %c0_27] : memref<8x1xf32, #tpu.memory_space<vmem>>, vector<8x1xf32>
    %55 = vector.broadcast %54 : vector<8x1xf32> to vector<8x256xf32>
    %56 = arith.addf %53, %55 : vector<8x256xf32>
    %57 = arith.addf %56, %1 : vector<8x256xf32>
    %cst_28 = arith.constant 0.000000e+00 : f32
    %58 = vector.broadcast %cst_28 : f32 to vector<8x256xf32>
    %59 = arith.maximumf %57, %58 : vector<8x256xf32>
    %c0_29 = arith.constant 0 : index
    %c0_30 = arith.constant 0 : index
    %c0_31 = arith.constant 0 : index
    %60 = vector.load %arg9[%c0_29, %c0_30, %c0_31] : memref<1x8x256xf32, #tpu.memory_space<vmem>>, vector<1x8x256xf32>
    %61 = vector.shape_cast %60 : vector<1x8x256xf32> to vector<8x256xf32>
    %62 = vector.shape_cast %59 : vector<8x256xf32> to vector<1x8x256xf32>
    tpu.vector_store %arg9[%c0_29, %c0_30, %c0_31], %62 {strides = array<i32>} : memref<1x8x256xf32, #tpu.memory_space<vmem>>, vector<1x8x256xf32>,
    return
  }
  func.func @transform_0(%arg0: i32) -> (i32, i32, i32) {
    %c0_i32 = arith.constant 0 : i32
    %c0_i32_0 = arith.constant 0 : i32
    %c0_i32_1 = arith.constant 0 : i32
    return %arg0, %c0_i32, %c0_i32_0 : i32, i32, i32
  }
  func.func @transform_1(%arg0: i32) -> (i32, i32) {
    %c0_i32 = arith.constant 0 : i32
    %c0_i32_0 = arith.constant 0 : i32
    %c0_i32_1 = arith.constant 0 : i32
    return %c0_i32, %c0_i32_0 : i32, i32
  }
  func.func @transform_2(%arg0: i32) -> (i32, i32) {
    %c0_i32 = arith.constant 0 : i32
    %c0_i32_0 = arith.constant 0 : i32
    %c0_i32_1 = arith.constant 0 : i32
    return %c0_i32, %c0_i32_0 : i32, i32
  }
  func.func @transform_3(%arg0: i32) -> (i32, i32) {
    %c0_i32 = arith.constant 0 : i32
    %c0_i32_0 = arith.constant 0 : i32
    %c0_i32_1 = arith.constant 0 : i32
    return %c0_i32, %c0_i32_0 : i32, i32
  }
  func.func @transform_4(%arg0: i32) -> (i32, i32) {
    %c0_i32 = arith.constant 0 : i32
    %c0_i32_0 = arith.constant 0 : i32
    %c0_i32_1 = arith.constant 0 : i32
    return %c0_i32, %c0_i32_0 : i32, i32
  }
  func.func @transform_5(%arg0: i32) -> (i32, i32) {
    %c0_i32 = arith.constant 0 : i32
    %c0_i32_0 = arith.constant 0 : i32
    %c0_i32_1 = arith.constant 0 : i32
    return %c0_i32, %c0_i32_0 : i32, i32
  }
  func.func @transform_6(%arg0: i32) -> (i32, i32) {
    %c0_i32 = arith.constant 0 : i32
    %c0_i32_0 = arith.constant 0 : i32
    %c0_i32_1 = arith.constant 0 : i32
    return %c0_i32, %c0_i32_0 : i32, i32
  }
  func.func @transform_7(%arg0: i32) -> (i32, i32) {
    %c0_i32 = arith.constant 0 : i32
    %c0_i32_0 = arith.constant 0 : i32
    %c0_i32_1 = arith.constant 0 : i32
    return %c0_i32, %c0_i32_0 : i32, i32
  }
  func.func @transform_8(%arg0: i32) -> (i32, i32, i32) {
    %c0_i32 = arith.constant 0 : i32
    %c0_i32_0 = arith.constant 0 : i32
    %c0_i32_1 = arith.constant 0 : i32
    return %arg0, %c0_i32, %c0_i32_0 : i32, i32, i32
  }
}

</mosaic_0001>

<bundles_post_ra>
// kernel: tpu_custom_call.1
= control target key start
LH: loop header
LB: loop body
LE: loop exit
PB: predicated region body
PF: predicated region fallthrough
CT: control target
= control target key end

     0   :  { %13 = vsyncpa [#allocation3], 0  ;;  %s1476_s0 = inlined_call_operand.hbm [shape: f32[2,8,256], index: 0, kind: input, shape index: {}]   ;;  %s1477_s1 = inlined_call_operand.vmem [shape: f32[4,8], index: 1, kind: input, shape index: {}]   ;;  %s1478_s2 = inlined_call_operand.vmem [shape: f32[4,1], index: 2, kind: input, shape index: {}]   ;;  %s1479_s3 = inlined_call_operand.vmem [shape: f32[4,36], index: 3, kind: input, shape index: {}]   ;;  %s1480_s4 = inlined_call_operand.vmem [shape: f32[4,1], index: 4, kind: input, shape index: {}]   ;;  %s1481_s5 = inlined_call_operand.vmem [shape: f32[8,4], index: 5, kind: input, shape index: {}]   ;;  %s1482_s6 = inlined_call_operand.vmem [shape: f32[8,1], index: 6, kind: input, shape index: {}]   ;;  %s1483_s7 = inlined_call_operand.vmem [shape: f32[9,256], index: 7, kind: input, shape index: {}]   ;;  %s1484_s8 = inlined_call_operand.hbm [shape: f32[2,8,256], index: 8, kind: output, shape index: {}]  }
   0x1   :  { %15 = vsyncpa [#allocation3 + $0x1], 0 }
   0x2   :  { %16 = vsyncpa [#allocation4], 0 }
   0x3   :  { %18 = vsyncpa [#allocation4 + $0x1], 0  ;;  %s1154_s27 = smov 0   ;;  %s1156_s28 = smov 0  }
   0x4   :  { %s1158_s29 = smov 0   ;;  %s1160_s30 = smov 0  }
   0x5 LB: > { %s1175_s9 = sadd.s32 4294967295, %s1095_s30   ;;  %s902_s10 = sadd.s32 4294967294, %s1095_s30   ;;  %s1095_s30 = sphi %s1160_s30, %s1499_s30   ;;  %s1091_s29 = sphi %s1158_s29, %s1498_s29   ;;  %s1087_s28 = sphi %s1156_s28, %s1497_s28   ;;  %s1083_s27 = sphi %s1154_s27, %s1496_s27  }
   0x6   : > { %s1179_s11 = sadd.s32 1, %s1095_s30   ;;  %s31_s12 = sadd.s32 1, %s1091_s29 }
   0x7   : > { %s28_s13 = ssub.s32 %s1095_s30, %s1179_s11  ;;  %p38_p0 = scmp.ne.s32.totalorder %s1091_s29, %s1087_s28 }
   0x8   : > { %p29_p1 = scmp.eq.s32.totalorder %s28_s13, 0  ;;  %p39_p2 = scmp.eq.s32.totalorder %s1095_s30, 0 }
   0x9   : > { %p44_p3 = scmp.ne.s32.totalorder %s1087_s28, %s1083_s27  ;;  %p45_p4 = scmp.eq.s32.totalorder %s1175_s9, 0 }
   0xa   : > { %s1191_s14 = scalar_select %p29_p1, %s1091_s29, %s31_s12  }
   0xb   : > { %p1193_p5 = por %p39_p2, %p38_p0  ;;  %p1197_p6 = por %p45_p4, %p44_p3 }
   0xc   : > { %p215_p7 = scmp.eq.s32.totalorder %s1175_s9, 1  ;;  %p221_p8 = scmp.eq.s32.totalorder %s902_s10, 1 }
   0xd   : > { %p953_p10 = scmp.lt.s32.totalorder %s1095_s30, 2  ;;  %s262_s19 = sand.u32 1, %s1091_s29  }
   0xe   : > { %p1204_p11 = por %p215_p7, %p38_p0  ;;  %p1208_p12 = por %p221_p8, %p44_p3 }
   0xf   : > { %s931_s20 = sshll.u32 %s1095_s30, 8  ;;  %s905_s21 = sshll.u32 %s262_s19, 4 }
  0x10   : > { %s1488_s17 = scalar_select %p1204_p11, 1, 0 }
  0x11   : > { %s1489_s18 = scalar_select %p1208_p12, 1, 0 }
  0x12   : > { %s1217_s24 = scalar_lea.hbm %s1476_s0, %s931_s20  ;;  %s266_s25 = scalar_lea.vmem [#allocation2], %s905_s21 }
  0x13   : > { %s274_s26 = sshll.u32 %s266_s25, 4  ;;  %p1221_p13 = pnand %p953_p10, %p1193_p5  ;;  %s1225_s26 = int_to_ptr.vmem [resolvable:$true] %s274_s26 }
  0x14   : > { %s263_s12 = scalar_lea.sflag [#allocation3], %s262_s19  ;;  %s999_s13 = scalar_lea.hbm %s1217_s24, 256 }
  0x15   : > { %p1000_p2 = scmp.ne.s32.totalorder %s1217_s24, %s999_s13  ;;  %p1001_p3 = pneg %p1221_p13 }
  0x16   : > { %s1004_s21 = scalar_lea.hbm %s1476_s0, 512  ;;  %p1005_p5 = scmp.lt.u32.totalorder %s1217_s24, %s1476_s0 }
  0x17   : > { %p1002_p4 = pnand %p1001_p3, %p1000_p2  ;;  %p1006_p8 = scmp.lt.u32.totalorder %s1004_s21, %s999_s13 }
  0x18   : > { %p1008_p9 = scmp.lt.u32.totalorder %s999_s13, %s1217_s24 }
  0x19   : > { %p1003_p7 = pneg %p1002_p4  ;;  %p1007_p10 = por %p1006_p8, %p1005_p5 }
  0x1b   : > { %p1009_p0 = por %p1008_p9, %p1007_p10 }
  0x1d   : > { %p1010_p1 = pnand %p1009_p0, %p1003_p7 }
  0x1f   : > { %1013 = shalt.err (!%p1010_p1)
}
  0x20   : > { %s1014_s19 = scalar_lea.vmem %s1225_s26, 256  ;;  %s1097_s25 = smov [#allocation2]  }
  0x21   : > { %p1015_p2 = scmp.ne.s32.totalorder %s1225_s26, %s1014_s19  ;;  %s1019_s15 = sshll.u32 %s1097_s25, 4  ;;  %s1020_s15 = int_to_ptr.vmem [resolvable:$false] %s1019_s15 }
  0x22   : > { %s1021_s20 = scalar_lea.vmem %s1020_s15, 512  ;;  %p1022_p11 = scmp.lt.s32.totalorder %s1225_s26, %s1020_s15 }
  0x23   : > { %p1017_p4 = pnand %p1015_p2, %p1001_p3  ;;  %p1023_p5 = scmp.lt.s32.totalorder %s1021_s20, %s1014_s19 }
  0x25   : > { %p1018_p12 = pneg %p1017_p4  ;;  %p1024_p8 = por %p1023_p5, %p1022_p11 }
  0x27   : > { %p1025_p9 = pnand %p1024_p8, %p1018_p12 }
  0x29   : > { %1028 = shalt.err (!%p1025_p9)
}
  0x2a   : > { %948 = dma.hbm_to_vmem [thread:$0]  (!%p1221_p13), %s1217_s24, 256, %s1225_s26, %s263_s12  }
  0x2b   : > { %p1491_p0 = scmp.lt.s32.totalorder %s1095_s30, 3  ;;  %p1492_p1 = scmp.ge.s32.totalorder %s1095_s30, 1 }
  0x2d   : > { %p280_p3 = pnand %p1492_p1, %p1491_p0 }
  0x2e   : > { %s1259_s13 = sand.u32 (!%p280_p3), 1, %s1087_s28  }
  0x2f   : > { %283 = sbr.rel (%p280_p3) target bundleno = 879 (0x36f), region = 52  ;;  %s909_s21 = sshll.u32 (!%p280_p3), %s1259_s13, 4 }
  0x30   : > { %s286_s22 = scalar_lea.sflag (!%p280_p3), [#allocation3], %s1259_s13  ;;  %s289_s10 = scalar_lea.vmem (!%p280_p3), [#allocation2], %s909_s21 }
  0x36   : > { %1074 = dma.done.wait (%p1197_p6), %s286_s22, 256  }
  0x37   : > { %1076 = vsyncadd (%p1197_p6), %s286_s22, 4294967040  ;;  %v1098_v0 = vmov 0.0   ;;  %v1099_v1 = vmov 0   ;;  %v1269_v2 = vld [vmem:[%s289_s10 + $0x8] sm:$0xff]  ;;  %v1271_v3 = vld [vmem:[%s289_s10] sm:$0xff]  ;;  %vm331_vm0 = vcmask 64512   ;;  %v412_v15 = vlaneseq }
  0x38   : > { %399 = vmatprep.mubr.f32.mxu0 %v1098_v0  ;;  %997 = vset.pattern.permute.xlu0 %v1099_v1  ;;  %v324_v4 = vld [vmem:[%s1477_s1] sm:$0xf]  ;;  %s1100_s23 = smov 1   ;;  %s1101_s19 = smov 16   ;;  %vm624_vm6 = vcmask 1043456   ;;  %vm640_vm10 = vcmask 293888  }
  0x39   : > { %714 = vmatprep.mubr.f32.mxu1 %v1098_v0  ;;  %998 = vset.pattern.permute.xlu1 %v1099_v1  ;;  %v325_v5 = vld [vmem:[%s1478_s2] sm:$0xf]  ;;  %s1102_s25 = smov 17   ;;  %s1103_s15 = smov 15   ;;  %v420_v18 = vshrl.u32 %v412_v15, 7  ;;  %v1307_v21 = vand.u32 127, %v412_v15 }
  0x3a   : > { %335 = vmatprep.subr.mxu0 %v1269_v2  ;;  %328 = vperm.xlu0 %997, %v325_v5   ;;  %s1104_s20 = smov 127   ;;  %s1105_s22 = smov 112   ;;  %v724_v13 = vld [vmem:[%s1482_s6] sm:$0xff]  ;;  %vm730_vm11 = vcmask 31744  }
  0x3b   : > { %336 = vmatpush1.msra.mxu0 %v1271_v3  ;;  %s1106_s10 = smov 113   ;;  %s1107_s24 = smov 111   ;;  %v634_v14 = vld [vmem:[%s1480_s4] sm:$0xf]  ;;  %v1309_v22 = vsub.s32 0, %v420_v18  ;;  %v1311_v23 = vsub.s32 1, %v420_v18 }
  0x3c   : > { %911 = vmatmul.mubr.msk.f32.vlgmr.msra.gmra.mrb[0].mxu0 %vm331_vm0, %v324_v4  ;;  %v914_v24 = vld [vmem:[%s1483_s7 + $0x3] ss:$8 sm:$0x3]  ;;  %v1319_v25 = vld [vmem:[%s1483_s7 + $0x4] ss:$8 sm:$0x3] }
  0x3d   : > { %804 = vmatprep.mubr.f32.mxu0 %v1098_v0  ;;  %v417_v27 = vld [vmem:[%s1483_s7] ss:$8 sm:$0x3]  ;;  %v913_v29 = vld [vmem:[%s1483_s7 + $0x2] ss:$8 sm:$0x3]  ;;  %v488_v30 = vrot.slane %v914_v24, %v1309_v22  ;;  %v507_v32 = vrot.slane %v1319_v25, %v1311_v23  ;;  %v503_v33 = vrot.slane %v1319_v25, %v1309_v22  ;;  %v492_v34 = vrot.slane %v914_v24, %v1311_v23 }
  0x3e   : > { %vm479_vm1 = vcmp.lt.s32.totalorder %v1307_v21, 1  ;;  %v912_v31 = vld [vmem:[%s1483_s7 + $0x1] ss:$8 sm:$0x3]  ;;  %vm414_vm2 = vcmp.lt.s32.totalorder %v1307_v21, 17  ;;  %vm457_vm3 = vcmp.lt.s32.totalorder %v1307_v21, 15  ;;  %v422_v35 = vrot.slane %v417_v27, %v1309_v22 }
  0x3f   : > { %vm435_vm4 = vcmp.lt.s32.totalorder %v1307_v21, 16  ;;  %v426_v36 = vrot.slane %v417_v27, %v1311_v23  ;;  %v466_v37 = vrot.slane %v913_v29, %v1309_v22  ;;  %v470_v38 = vrot.slane %v913_v29, %v1311_v23  ;;  %v916_v39 = vld [vmem:[%s1483_s7 + $0x5] ss:$8 sm:$0x3]  ;;  %p1493_p11 = scmp.ne.s32.totalorder %s1488_s17, 0 }
  0x40   : > { %v918_v40 = vld [vmem:[%s1483_s7 + $0x7] ss:$8 sm:$0x3]  ;;  %v444_v45 = vrot.slane %v912_v31, %v1309_v22  ;;  %v448_v46 = vrot.slane %v912_v31, %v1311_v23  ;;  %vm516_vm5 = vcmp.lt.s32.totalorder %v1307_v21, 127  ;;  %v525_v49 = vrot.slane %v916_v39, %v1309_v22 }
  0x41   : > { %v529_v50 = vrot.slane %v916_v39, %v1311_v23  ;;  %vm560_vm7 = vcmp.lt.s32.totalorder %v1307_v21, 112  ;;  %v569_v51 = vrot.slane %v918_v40, %v1309_v22  ;;  %v573_v54 = vrot.slane %v918_v40, %v1311_v23  ;;  %v917_v55 = vld [vmem:[%s1483_s7 + $0x6] ss:$8 sm:$0x3] }
  0x42   : > { %vm538_vm8 = vcmp.lt.s32.totalorder %v1307_v21, 113  ;;  %vm582_vm9 = vcmp.lt.s32.totalorder %v1307_v21, 111 }
  0xb9   : > { %v329_v6 = vpop.permute.xlu0 %328 }
 0x10f   : > { %v401_v7 = vpop.f32.mrb[0].mxu0 }
 0x110   : > { %v402_v8 = vadd.f32 %v401_v7, %v329_v6  ;;  %v403_v9 = vpop.f32.mrb[1].mxu0  ;;  %v551_v7 = vrot.slane %v917_v55, %v1311_v23 }
 0x111   : > { %v404_v11 = vadd.f32 %v403_v9, %v329_v6  ;;  %v547_v6 = vrot.slane %v917_v55, %v1309_v22 }
 0x112   : > { %v1281_v10 = vmax.f32 %v402_v8, 0.0 }
 0x113   : > { %v1285_v12 = vmax.f32 %v404_v11, 0.0 }
 0x114   : > { %475 = vrot.lane.b32.xlu1 %v1281_v10, %s1100_s23  ;;  %431 = vrot.lane.b32.xlu0 %v1281_v10, %s1101_s19 }
 0x118   : > { %408 = vrot.lane.b32.xlu1 %v1281_v10, %s1102_s25  ;;  %477 = vrot.lane.b32.xlu0 %v1285_v12, %s1100_s23 }
 0x11c   : > { %453 = vrot.lane.b32.xlu1 %v1281_v10, %s1103_s15  ;;  %410 = vrot.lane.b32.xlu0 %v1285_v12, %s1102_s25  ;;  %s321_s25 = scalar_lea.vmem [#allocation5], %s909_s21  ;;  %s1108_s21 = smov [#allocation5]  }
 0x11d   : > { %s1033_s26 = sshll.u32 %s1108_s21, 4  ;;  %s1034_s26 = int_to_ptr.vmem [resolvable:$false] %s1033_s26 }
 0x11e   : > { %s1035_s12 = scalar_lea.vmem %s1034_s26, 512 }
 0x120   : > { %512 = vrot.lane.b32.xlu1 %v1281_v10, %s1104_s20  ;;  %455 = vrot.lane.b32.xlu0 %v1285_v12, %s1103_s15  ;;  %s832_s15 = sshll.u32 %s321_s25, 4  ;;  %s1434_s15 = int_to_ptr.vmem [resolvable:$true] %s832_s15 }
 0x121   : > { %p1036_p7 = scmp.lt.s32.totalorder %s1434_s15, %s1034_s26 }
 0x124   : > { %433 = vrot.lane.b32.xlu1 %v1285_v12, %s1101_s19  ;;  %514 = vrot.lane.b32.xlu0 %v1285_v12, %s1104_s20  ;;  %s932_s19 = sshll.u32 %s1175_s9, 8  ;;  %s818_s9 = scalar_lea.sflag [#allocation4], %s1259_s13 }
 0x128   : > { %556 = vrot.lane.b32.xlu1 %v1281_v10, %s1105_s22  ;;  %558 = vrot.lane.b32.xlu0 %v1285_v12, %s1105_s22 }
 0x12c   : > { %534 = vrot.lane.b32.xlu1 %v1281_v10, %s1106_s10  ;;  %536 = vrot.lane.b32.xlu0 %v1285_v12, %s1106_s10  ;;  %s1432_s10 = scalar_lea.hbm %s1484_s8, %s932_s19 }
 0x130   : > { %578 = vrot.lane.b32.xlu1 %v1281_v10, %s1107_s24  ;;  %580 = vrot.lane.b32.xlu0 %v1285_v12, %s1107_s24  ;;  %s1029_s24 = scalar_lea.vmem %s1434_s15, 256 }
 0x131   : > { %p1030_p6 = scmp.ne.s32.totalorder %s1434_s15, %s1029_s24  ;;  %p1037_p10 = scmp.lt.s32.totalorder %s1035_s12, %s1029_s24 }
 0x133   : > { %p1031_p12 = pnand %p1030_p6, %p1493_p11  ;;  %p1038_p2 = por %p1037_p10, %p1036_p7 }
 0x134   : > { %727 = vperm.xlu0 %997, %v724_v13   ;;  %637 = vperm.xlu1 %998, %v634_v14  }
 0x135   : > { %p1032_p13 = pneg %p1031_p12 }
 0x137   : > { %p1039_p4 = pnand %p1038_p2, %p1032_p13 }
 0x186   : > { %v476_v16 = vpop.permute.xlu1 %475  ;;  %v432_v17 = vpop.permute.xlu0 %431 }
 0x18a   : > { %v409_v19 = vpop.permute.xlu1 %408  ;;  %v478_v20 = vpop.permute.xlu0 %477 }
 0x18b   : > { %v480_v41 = vsel %vm479_vm1, %v476_v16, %v478_v20  ;;  %v481_v42 = vsel %vm479_vm1, %v478_v20, %v476_v16 }
 0x18c   : > { %v495_v52 = vmul.f32 %v488_v30, %v481_v42  ;;  %v496_v53 = vmul.f32 %v492_v34, %v480_v41  ;;  %v919_v34 = vld [vmem:[%s1483_s7 + $0x10] ss:$8 sm:$0x3]  ;;  %v511_v41 = vmul.f32 %v507_v32, %v1285_v12  ;;  %v510_v42 = vmul.f32 %v503_v33, %v1281_v10 }
 0x18e   : > { %v454_v26 = vpop.permute.xlu1 %453  ;;  %v411_v28 = vpop.permute.xlu0 %410  ;;  %v608_v8 = vrot.slane %v495_v52, 4  ;;  %v609_v9 = vrot.slane %v496_v53, 4  ;;  %v591_v53 = vrot.slane %v919_v34, %v1309_v22 }
 0x18f   : > { %v415_v56 = vsel %vm414_vm2, %v409_v19, %v411_v28  ;;  %v416_v57 = vsel %vm414_vm2, %v411_v28, %v409_v19 }
 0x190   : > { %v429_v11 = vmul.f32 %v422_v35, %v416_v57  ;;  %v430_v13 = vmul.f32 %v426_v36, %v415_v56  ;;  %v633_v57 = vld [vmem:[%s1479_s3] sm:$0xf] }
 0x192   : > { %v513_v43 = vpop.permute.xlu1 %512  ;;  %v456_v44 = vpop.permute.xlu0 %455 }
 0x193   : > { %v458_v47 = vsel %vm457_vm3, %v454_v26, %v456_v44  ;;  %v459_v48 = vsel %vm457_vm3, %v456_v44, %v454_v26 }
 0x194   : > { %v473_v58 = vmul.f32 %v466_v37, %v459_v48  ;;  %v474_v59 = vmul.f32 %v470_v38, %v458_v47 }
 0x196   : > { %v434_v60 = vpop.permute.xlu1 %433  ;;  %v515_v61 = vpop.permute.xlu0 %514  ;;  %v628_v26 = vsel %vm624_vm6, %v474_v59, %v609_v9  ;;  %v627_v27 = vsel %vm624_vm6, %v473_v58, %v608_v8 }
 0x197   : > { %v436_v62 = vsel %vm435_vm4, %v432_v17, %v434_v60  ;;  %v437_v63 = vsel %vm435_vm4, %v434_v60, %v432_v17  ;;  %v517_v0 = vsel %vm516_vm5, %v513_v43, %v515_v61  ;;  %v518_v1 = vsel %vm516_vm5, %v515_v61, %v513_v43 }
 0x198   : > { %v451_v4 = vmul.f32 %v444_v45, %v437_v63  ;;  %v452_v5 = vmul.f32 %v448_v46, %v436_v62  ;;  %v532_v16 = vmul.f32 %v525_v49, %v517_v0  ;;  %v533_v17 = vmul.f32 %v529_v50, %v518_v1  ;;  %v723_v63 = vld [vmem:[%s1481_s5] sm:$0xff] }
 0x199   : > { %v595_v45 = vrot.slane %v919_v34, %v1311_v23 }
 0x19a   : > { %v602_v14 = vrot.slane %v451_v4, 4  ;;  %v603_v15 = vrot.slane %v452_v5, 4  ;;  %v557_v18 = vpop.permute.xlu1 %556  ;;  %v559_v19 = vpop.permute.xlu0 %558  ;;  %v614_v37 = vrot.slane %v532_v16, 4  ;;  %v615_v38 = vrot.slane %v533_v17, 4 }
 0x19b   : > { %v561_v20 = vsel %vm560_vm7, %v557_v18, %v559_v19  ;;  %v562_v24 = vsel %vm560_vm7, %v559_v19, %v557_v18 }
 0x19c   : > { %v576_v28 = vmul.f32 %v569_v51, %v561_v20  ;;  %v577_v29 = vmul.f32 %v573_v54, %v562_v24  ;;  %v626_v30 = vsel %vm624_vm6, %v430_v13, %v603_v15  ;;  %v625_v31 = vsel %vm624_vm6, %v429_v11, %v602_v14 }
 0x19d   : > { %v933_v35 = vpack.c.bf16 %v628_v26, %v626_v30  ;;  %v935_v36 = vpack.c.bf16 %v627_v27, %v625_v31  ;;  %v630_v10 = vsel %vm624_vm6, %v511_v41, %v615_v38  ;;  %v629_v33 = vsel %vm624_vm6, %v510_v42, %v614_v37 }
 0x19e   : > { %v535_v39 = vpop.permute.xlu1 %534  ;;  %v537_v40 = vpop.permute.xlu0 %536  ;;  %v620_v46 = vrot.slane %v576_v28, 4  ;;  %v621_v47 = vrot.slane %v577_v29, 4 }
 0x19f   : > { %v539_v43 = vsel %vm538_vm8, %v535_v39, %v537_v40  ;;  %v540_v44 = vsel %vm538_vm8, %v537_v40, %v535_v39  ;;  %934 = vmatprep.subr.bf16.mxu1 %v933_v35 }
 0x1a0   : > { %v554_v48 = vmul.f32 %v547_v6, %v539_v43  ;;  %v555_v12 = vmul.f32 %v551_v7, %v540_v44  ;;  %936 = vmatpush1.bf16.msra.mxu1 %v935_v36 }
 0x1a2   : > { %v579_v32 = vpop.permute.xlu1 %578  ;;  %v581_v49 = vpop.permute.xlu0 %580  ;;  %v632_v25 = vsel %vm624_vm6, %v555_v12, %v621_v47  ;;  %v631_v50 = vsel %vm624_vm6, %v554_v48, %v620_v46 }
 0x1a3   : > { %v584_v51 = vsel %vm582_vm9, %v581_v49, %v579_v32  ;;  %v937_v52 = vpack.c.bf16 %v632_v25, %v630_v10  ;;  %v939_v23 = vpack.c.bf16 %v631_v50, %v629_v33  ;;  %v583_v55 = vsel %vm582_vm9, %v579_v32, %v581_v49 }
 0x1a4   : > { %v599_v54 = vmul.f32 %v595_v45, %v584_v51  ;;  %v598_v56 = vmul.f32 %v591_v53, %v583_v55 }
 0x1a5   : > { %938 = vmatprep.subr.bf16.mxu1 %v937_v52 }
 0x1a6   : > { %940 = vmatpush1.bf16.msra.mxu1 %v939_v23 }
 0x1a7   : > { %920 = vmatprep.subr.msk.mxu1 %vm624_vm6, %v599_v54 }
 0x1aa   : > { %921 = vmatpush1.msk.msra.mxu1 %vm624_vm6, %v598_v56 }
 0x1ab   : > { %922 = vmatmul.mubr.msk.f32.vlgmr.msra.gmra.mrb[0].mxu1 %vm640_vm10, %v633_v57 }
 0x1b3   : > { %v638_v58 = vpop.permute.xlu1 %637  ;;  %v728_v0 = vpop.permute.xlu0 %727 }
 0x27e   : > { %v716_v59 = vpop.f32.mrb[0].mxu1 }
 0x27f   : > { %v717_v22 = vadd.f32 %v716_v59, %v638_v58  ;;  %v718_v60 = vpop.f32.mrb[1].mxu1 }
 0x280   : > { %v719_v21 = vadd.f32 %v718_v60, %v638_v58 }
 0x281   : > { %v721_v62 = vmax.f32 %v717_v22, 0.0 }
 0x282   : > { %v722_v61 = vmax.f32 %v719_v21, 0.0 }
 0x284   : > { %923 = vmatprep.subr.msk.mxu0 %vm624_vm6, %v722_v61 }
 0x285   : > { %924 = vmatpush1.msk.msra.mxu0 %vm624_vm6, %v721_v62 }
 0x286   : > { %925 = vmatmul.mubr.msk.f32.vlgmr.msra.gmra.mrb[2].mxu0 %vm730_vm11, %v723_v63 }
 0x359   : > { %v806_v1 = vpop.f32.mrb[2].mxu0 }
 0x35a   : > { %v807_v4 = vadd.f32 %v806_v1, %v728_v0  ;;  %v808_v5 = vpop.f32.mrb[3].mxu0 }
 0x35b   : > { %v809_v6 = vadd.f32 %v808_v5, %v728_v0 }
 0x35c   : > { %v811_v7 = vadd.f32 %v807_v4, %v1271_v3 }
 0x35d   : > { %v812_v8 = vadd.f32 %v809_v6, %v1269_v2 }
 0x35e   : > { %v813_v9 = vmax.f32 %v811_v7, 0.0 }
 0x35f   : > { %v814_v11 = vmax.f32 %v812_v8, 0.0 }
 0x360   : > { %815 = vst [vmem:[%s321_s25] sm:$0xff] %v813_v9 }
 0x361   : > { %816 = vst [vmem:[%s321_s25 + $0x8] sm:$0xff] %v814_v11 }
 0x362   : > { %1042 = shalt.err (!%p1039_p4)
}
 0x363   : > { %s1043_s13 = scalar_lea.hbm %s1432_s10, 256  ;;  %s1047_s19 = scalar_lea.hbm %s1484_s8, 512 }
 0x364   : > { %p1044_p5 = scmp.ne.s32.totalorder %s1432_s10, %s1043_s13  ;;  %p1048_p0 = scmp.lt.u32.totalorder %s1432_s10, %s1484_s8 }
 0x365   : > { %p1049_p1 = scmp.lt.u32.totalorder %s1047_s19, %s1043_s13  ;;  %p1051_p6 = scmp.lt.u32.totalorder %s1043_s13, %s1432_s10 }
 0x366   : > { %p1045_p8 = pnand %p1044_p5, %p1493_p11 }
 0x367   : > { %p1050_p3 = por %p1049_p1, %p1048_p0 }
 0x368   : > { %p1046_p9 = pneg %p1045_p8 }
 0x369   : > { %p1052_p12 = por %p1051_p6, %p1050_p3 }
 0x36b   : > { %p1053_p13 = pnand %p1052_p12, %p1046_p9 }
 0x36d   : > { %1056 = shalt.err (!%p1053_p13)
}
 0x36e   : > { %943 = dma.vmem_to_hbm [thread:$0]  (%p1493_p11), %s1434_s15, 256, %s1432_s10, %s818_s9  }
 0x36f PF: > { %s844_s22 = sand.u32 1, %s1083_s27   ;;  %p1494_p7 = scmp.ne.s32.totalorder %s1489_s18, 0 }
 0x370   : > { %p1495_p10 = scmp.ge.s32.totalorder %s1095_s30, 2  ;;  %s845_s24 = scalar_lea.sflag [#allocation4], %s844_s22 }
 0x372   : > { %p950_p2 = pnand %p1495_p10, %p1494_p7 }
 0x374   : > { %1078 = dma.done.wait (!%p950_p2), %s845_s24, 256  }
 0x375   : > { %1080 = vsyncadd (!%p950_p2), %s845_s24, 4294967040  ;;  %p21_p4 = scmp.ge.s32.totalorder %s1179_s11, 4   ;;  %s1496_s27 = smov %s1087_s28 }
 0x376   : > { %s1497_s28 = smov %s1091_s29  ;;  %s1498_s29 = smov %s1191_s14 }
 0x377   : > { %s1499_s30 = smov %s1179_s11  ;;  %23 = sbr.rel (!%p21_p4) target bundleno = 5 (0x5), region = 105 }
 0x37e   :  { %850 = vsyncpa [#allocation3], 1 }
 0x37f   :  { %852 = vsyncpa [#allocation3 + $0x1], 1 }
 0x380   :  { %853 = vsyncpa [#allocation4], 1 }
 0x381   :  { %855 = vsyncpa [#allocation4 + $0x1], 1 }

</bundles_post_ra>
